<compile_context>
chip_gen: v7x
topology: tpu7x:2x2x1
jax: 0.10.0
libtpu: 0.0.40
codegen_flags: <defaults>
</compile_context>

<pallas_src>
import math

import jax
import jax.numpy as jnp
from jax.experimental import pallas as pl
from jax.experimental.pallas import tpu as pltpu


def _round_up(x, m):
    return ((x + m - 1) // m) * m


# ----------------------------------------------------------------------------
# Pallas kernel:  out = relu(fourhot(gidx) @ T_stacked + bias)
#   gidx_ref  : (tm, 4)  int32   -- 4 combined gather indices per output row
#   table_ref : (4*Rp, H) float32 -- folded tables T_ss|T_se|T_es|T_ee, stacked
#   bias_ref  : (1, H)   float32
#   o_ref     : (tm, H)  float32
# ----------------------------------------------------------------------------
def fusion_ff_kernel(gidx_ref, table_ref, bias_ref, o_ref):
    tm = gidx_ref.shape[0]
    k4 = table_ref.shape[0]

    g = gidx_ref[...]                                        # (tm, 4) int32
    iota = jax.lax.broadcasted_iota(jnp.int32, (tm, k4), 1)  # (tm, k4)

    # The four index blocks are disjoint, so OR of the one-hots == 4-hot sum.
    hit = (iota == g[:, 0:1])
    hit = hit | (iota == g[:, 1:2])
    hit = hit | (iota == g[:, 2:3])
    hit = hit | (iota == g[:, 3:4])
    fourhot = hit.astype(jnp.float32)                        # (tm, k4)

    # Single MXU matmul selects and sums the 4 folded table rows per output row.
    acc = jnp.dot(fourhot, table_ref[...], preferred_element_type=jnp.float32)
    acc = acc + bias_ref[...]                                # (1, H) broadcast
    o_ref[...] = jnp.maximum(acc, 0.0).astype(o_ref.dtype)


def fusion_ff_pallas(gidx, table, bias, *, tm=512):
    """gidx: (N, 4) int32; table: (4*Rp, H) f32; bias: (H,) f32 -> (N, H) f32."""
    n = gidx.shape[0]
    h = table.shape[1]

    tm_eff = min(tm, _round_up(n, 8))          # keep row-tile a multiple of 8
    grid = pl.cdiv(n, tm_eff)
    n_pad = grid * tm_eff
    if n_pad != n:
        # Only the tiny int32 index array is padded (16 B/row), not (N, H) data.
        gidx = jnp.pad(gidx, ((0, n_pad - n), (0, 0)))

    out = pl.pallas_call(
        fusion_ff_kernel,
        out_shape=jax.ShapeDtypeStruct((n_pad, h), jnp.float32),
        grid_spec=pltpu.PrefetchScalarGridSpec(
            num_scalar_prefetch=0,
            grid=(grid,),
            in_specs=[
                pl.BlockSpec((tm_eff, 4), lambda i: (i, 0)),       # streamed
                pl.BlockSpec(tuple(table.shape), lambda i: (0, 0)),  # resident
                pl.BlockSpec((1, h), lambda i: (0, 0)),            # resident
            ],
            out_specs=pl.BlockSpec((tm_eff, h), lambda i: (i, 0)),
        ),
        compiler_params=pltpu.CompilerParams(
            dimension_semantics=("parallel",)),
    )(gidx, table, bias.reshape(1, h))

    return out[:n]


# ----------------------------------------------------------------------------
# Full forward: fold Linear into tables, build fused gather indices, run kernel.
# ----------------------------------------------------------------------------
def four_pos_fusion_embedding(pos_s, pos_e,
                              pe_ss, pe_se, pe_es, pe_ee,
                              w_t, bias, max_seq_len, *, tm=512):
    """Equivalent of Four_Pos_Fusion_Embedding(four_pos_fusion='ff').forward."""
    batch, seq = pos_s.shape
    hidden = pe_ss.shape[-1]
    r = pe_ss.shape[0]                         # 2*max_seq_len + 1
    r_pad = _round_up(r, 8)
    hp = jax.lax.Precision.HIGHEST

    # ---- Fold the Linear into the tables (constants): T_k = pe_k @ W_k ------
    folded = []
    for k, pe in enumerate((pe_ss, pe_se, pe_es, pe_ee)):
        w_k = w_t[k * hidden:(k + 1) * hidden]            # (H, H)
        t_k = jnp.dot(pe.astype(jnp.float32), w_k, precision=hp)  # (R, H)
        folded.append(jnp.pad(t_k, ((0, r_pad - r), (0, 0))))
    table = jnp.concatenate(folded, axis=0)               # (4*Rp, H)

    # ---- Pairwise position differences -> combined gather indices -----------
    pos_ss = pos_s[:, :, None] - pos_s[:, None, :]
    pos_se = pos_s[:, :, None] - pos_e[:, None, :]
    pos_es = pos_e[:, :, None] - pos_s[:, None, :]
    pos_ee = pos_e[:, :, None] - pos_e[:, None, :]

    gidx = jnp.stack(
        [pos_ss + max_seq_len,
         pos_se + max_seq_len + r_pad,
         pos_es + max_seq_len + 2 * r_pad,
         pos_ee + max_seq_len + 3 * r_pad],
        axis=-1).reshape(-1, 4).astype(jnp.int32)          # (B*S*S, 4)

    out = fusion_ff_pallas(gidx, table, bias, tm=tm)       # (B*S*S, H)
    return out.reshape(batch, seq, seq, hidden)


# ----------------------------------------------------------------------------
# Deterministic parameter construction
# ----------------------------------------------------------------------------
def sinusoidal_table(num_embeddings, embedding_dim):
    half = embedding_dim // 2
    scale = math.log(10000.0) / max(half - 1, 1)
    freqs = jnp.exp(jnp.arange(half, dtype=jnp.float32) * -scale)
    pos = jnp.arange(num_embeddings, dtype=jnp.float32)[:, None] * freqs[None, :]
    return jnp.concatenate([jnp.sin(pos), jnp.cos(pos)], axis=-1)


if __name__ == "__main__":
    key = jax.random.PRNGKey(0)

    batch = 2
    seq = 8            # sequence length of the incoming pos_s / pos_e
    max_seq_len = 16   # module's max_seq_len (table offset)
    hidden = 32

    # Four position tables, shape (2*max_seq_len + 1, hidden)
    table_rows = 2 * max_seq_len + 1
    pe_ss = sinusoidal_table(table_rows, hidden)
    pe_se = sinusoidal_table(table_rows, hidden) * 0.9
    pe_es = sinusoidal_table(table_rows, hidden) * 1.1
    pe_ee = sinusoidal_table(table_rows, hidden) * 0.8

    # nn.Linear(4*hidden, hidden): weight (hidden, 4*hidden), bias (hidden,)
    k_w, k_b, k_s, k_e = jax.random.split(key, 4)
    bound = 1.0 / math.sqrt(4 * hidden)
    w = jax.random.uniform(k_w, (hidden, 4 * hidden), jnp.float32, -bound, bound)
    bias = jax.random.uniform(k_b, (hidden,), jnp.float32, -bound, bound)
    w_t = w.T  # (4H, H) so that out = x @ w_t + bias

    # Example inputs: heads/tails in [0, max_seq_len), with tail >= head.
    pos_s = jax.random.randint(k_s, (batch, seq), 0, max_seq_len, dtype=jnp.int32)
    extra = jax.random.randint(k_e, (batch, seq), 0, 3, dtype=jnp.int32)
    pos_e = jnp.minimum(pos_s + extra, max_seq_len - 1)

    out = four_pos_fusion_embedding(pos_s, pos_e, pe_ss, pe_se, pe_es, pe_ee,
                                    w_t, bias, max_seq_len)
    out = jax.block_until_ready(out)

    # Pure-JAX reference (gather -> concat -> matmul -> ReLU), spec-faithful.
    def ref(pos_s, pos_e):
        pos_ss = pos_s[:, :, None] - pos_s[:, None, :]
        pos_se = pos_s[:, :, None] - pos_e[:, None, :]
        pos_es = pos_e[:, :, None] - pos_s[:, None, :]
        pos_ee = pos_e[:, :, None] - pos_e[:, None, :]
        g = lambda t, p: jnp.take(t, (p + max_seq_len).reshape(-1), axis=0).reshape(
            batch, seq, seq, hidden)
        pe4 = jnp.concatenate([g(pe_ss, pos_ss), g(pe_se, pos_se),
                               g(pe_es, pos_es), g(pe_ee, pos_ee)], axis=-1)
        return jax.nn.relu(
            jnp.dot(pe4, w_t, precision=jax.lax.Precision.HIGHEST) + bias)

    ref_out = ref(pos_s, pos_e)
    assert out.shape == (batch, seq, seq, hidden)
    assert jnp.allclose(out, ref_out, atol=1e-4, rtol=1e-4)

    print("KERNEL_OK")
</pallas_src>

<mosaic_0001>
module attributes {stable_mosaic.version = 11 : i64} {
  func.func @fusion_ff_kernel(%arg0: i32, %arg1: memref<128x4xi32, #tpu.memory_space<vmem>>, %arg2: memref<160x32xf32, #tpu.memory_space<vmem>>, %arg3: memref<1x32xf32, #tpu.memory_space<vmem>>, %arg4: memref<128x32xf32, #tpu.memory_space<vmem>>) attributes {dimension_semantics = [#tpu.dimension_semantics<parallel>], iteration_bounds = array<i64: 1>, scalar_prefetch = 0 : i64, scratch_operands = 0 : i64, tpu.core_type = #tpu.core_type<tc>, window_params = [{transform_indices = @transform_0, window_bounds = array<i64: 128, 4>}, {pipeline_mode = #tpu.pipeline_mode<synchronous>, transform_indices = @transform_1, window_bounds = array<i64: 160, 32>}, {pipeline_mode = #tpu.pipeline_mode<synchronous>, transform_indices = @transform_2, window_bounds = array<i64: 1, 32>}, {transform_indices = @transform_3, window_bounds = array<i64: 128, 32>}]} {
    %c0 = arith.constant 0 : index
    %c0_0 = arith.constant 0 : index
    %0 = vector.load %arg1[%c0, %c0_0] : memref<128x4xi32, #tpu.memory_space<vmem>>, vector<128x4xi32>
    %1 = tpu.iota {dimensions = array<i32: 1>} : vector<128x160xi32>
    %2 = vector.extract_strided_slice %0 {offsets = [0, 0], sizes = [128, 1], strides = [1, 1]} : vector<128x4xi32> to vector<128x1xi32>
    %3 = vector.broadcast %2 : vector<128x1xi32> to vector<128x160xi32>
    %4 = arith.cmpi eq, %1, %3 : vector<128x160xi32>
    %5 = vector.extract_strided_slice %0 {offsets = [0, 1], sizes = [128, 1], strides = [1, 1]} : vector<128x4xi32> to vector<128x1xi32>
    %6 = vector.broadcast %5 : vector<128x1xi32> to vector<128x160xi32>
    %7 = arith.cmpi eq, %1, %6 : vector<128x160xi32>
    %8 = arith.ori %4, %7 : vector<128x160xi1>
    %9 = vector.extract_strided_slice %0 {offsets = [0, 2], sizes = [128, 1], strides = [1, 1]} : vector<128x4xi32> to vector<128x1xi32>
    %10 = vector.broadcast %9 : vector<128x1xi32> to vector<128x160xi32>
    %11 = arith.cmpi eq, %1, %10 : vector<128x160xi32>
    %12 = arith.ori %8, %11 : vector<128x160xi1>
    %13 = vector.extract_strided_slice %0 {offsets = [0, 3], sizes = [128, 1], strides = [1, 1]} : vector<128x4xi32> to vector<128x1xi32>
    %14 = vector.broadcast %13 : vector<128x1xi32> to vector<128x160xi32>
    %15 = arith.cmpi eq, %1, %14 : vector<128x160xi32>
    %16 = arith.ori %12, %15 : vector<128x160xi1>
    %17 = arith.extui %16 : vector<128x160xi1> to vector<128x160xi32>
    %18 = arith.sitofp %17 : vector<128x160xi32> to vector<128x160xf32>
    %c0_1 = arith.constant 0 : index
    %c0_2 = arith.constant 0 : index
    %19 = vector.load %arg2[%c0_1, %c0_2] : memref<160x32xf32, #tpu.memory_space<vmem>>, vector<160x32xf32>
    %cst = arith.constant dense<0.000000e+00> : vector<128x32xf32>
    %20 = tpu.matmul %18, %19, %cst {dimension_numbers = #tpu.dot_dimension_numbers<[1], [0], [0], [1], [0, 0, 1, 1], [], []>} : vector<128x160xf32>, vector<160x32xf32>, vector<128x32xf32> -> vector<128x32xf32>
    %c0_3 = arith.constant 0 : index
    %c0_4 = arith.constant 0 : index
    %21 = vector.load %arg3[%c0_3, %c0_4] : memref<1x32xf32, #tpu.memory_space<vmem>>, vector<1x32xf32>
    %22 = vector.broadcast %21 : vector<1x32xf32> to vector<128x32xf32>
    %23 = arith.addf %20, %22 : vector<128x32xf32>
    %cst_5 = arith.constant 0.000000e+00 : f32
    %24 = vector.broadcast %cst_5 : f32 to vector<128x32xf32>
    %25 = arith.maximumf %23, %24 : vector<128x32xf32>
    %c0_6 = arith.constant 0 : index
    %c0_7 = arith.constant 0 : index
    %26 = vector.load %arg4[%c0_6, %c0_7] : memref<128x32xf32, #tpu.memory_space<vmem>>, vector<128x32xf32>
    tpu.vector_store %arg4[%c0_6, %c0_7], %25 {strides = array<i32>} : memref<128x32xf32, #tpu.memory_space<vmem>>, vector<128x32xf32>,
    return
  }
  func.func @transform_0(%arg0: i32) -> (i32, i32) {
    %c0_i32 = arith.constant 0 : i32
    %c0_i32_0 = arith.constant 0 : i32
    return %arg0, %c0_i32 : i32, i32
  }
  func.func @transform_1(%arg0: i32) -> (i32, i32) {
    %c0_i32 = arith.constant 0 : i32
    %c0_i32_0 = arith.constant 0 : i32
    %c0_i32_1 = arith.constant 0 : i32
    return %c0_i32, %c0_i32_0 : i32, i32
  }
  func.func @transform_2(%arg0: i32) -> (i32, i32) {
    %c0_i32 = arith.constant 0 : i32
    %c0_i32_0 = arith.constant 0 : i32
    %c0_i32_1 = arith.constant 0 : i32
    return %c0_i32, %c0_i32_0 : i32, i32
  }
  func.func @transform_3(%arg0: i32) -> (i32, i32) {
    %c0_i32 = arith.constant 0 : i32
    %c0_i32_0 = arith.constant 0 : i32
    return %arg0, %c0_i32 : i32, i32
  }
}

</mosaic_0001>

<bundles_post_ra>
// kernel: tpu_custom_call.1
= control target key start
LH: loop header
LB: loop body
LE: loop exit
PB: predicated region body
PF: predicated region fallthrough
CT: control target
= control target key end

     0   :  { %v929_v0 = vmov 2   ;;  %v930_v1 = vmov 1   ;;  %v931_v5 = vmov 0.0|0.0   ;;  %v932_v19 = vmov 3   ;;  %s1579_s0 = inlined_call_operand.vmem [shape: s32[128,4], index: 0, kind: input, shape index: {}]   ;;  %s1580_s1 = inlined_call_operand.vmem [shape: f32[160,32], index: 1, kind: input, shape index: {}]   ;;  %s1581_s2 = inlined_call_operand.vmem [shape: f32[1,32], index: 2, kind: input, shape index: {}]   ;;  %s1582_s3 = inlined_call_operand.vmem [shape: f32[128,32], index: 3, kind: output, shape index: {}]  }
   0x1   :  { %893 = vset.pattern.permute.xlu0 %v929_v0  ;;  %892 = vset.pattern.permute.xlu1 %v930_v1  ;;  %v14_v2 = vld [vmem:[%s1579_s0] sm:$0xff]  ;;  %v964_v3 = vld [vmem:[%s1579_s0 + $0x48] sm:$0xff]  ;;  %v515_v8 = vld [vmem:[%s1580_s1 + $0x10] sm:$0xff]  ;;  %v933_v23 = vmov 0   ;;  %v30_v55 = vlaneseq  ;;  %vm1583_vm11 = vcmask 261120  }
   0x2   :  { %226 = vperm.xlu0 %893, %v14_v2   ;;  %114 = vperm.xlu1 %892, %v14_v2   ;;  %v969_v4 = vld [vmem:[%s1579_s0 + $0x40] sm:$0xff]  ;;  %v514_v7 = vld [vmem:[%s1580_s1 + $0x8] sm:$0xff]  ;;  %v516_v10 = vld [vmem:[%s1580_s1 + $0x18] sm:$0xff] }
   0x3   :  { %835 = vmatprep.subr.bf16.mxu0 %v931_v5  ;;  %865 = vmatprep.subr.bf16.mxu1 %v931_v5  ;;  %v513_v6 = vld [vmem:[%s1580_s1] sm:$0xff]  ;;  %v990_v11 = vld [vmem:[%s1579_s0 + $0x18] sm:$0xff]  ;;  %v839_v12 = vpack.c.bf16 %v516_v10, %v515_v8  ;;  %v518_v14 = vld [vmem:[%s1580_s1 + $0x28] sm:$0xff]  ;;  %v1173_v58 = vand.u32 127, %v30_v55 }
   0x4   :  { %v836_v9 = vpack.c.bf16 %v514_v7, %v513_v6  ;;  %v517_v13 = vld [vmem:[%s1580_s1 + $0x20] sm:$0xff]  ;;  %v519_v17 = vld [vmem:[%s1580_s1 + $0x30] sm:$0xff]  ;;  %v520_v18 = vld [vmem:[%s1580_s1 + $0x38] sm:$0xff]  ;;  %v935_v7 = vmov 1.0  }
   0x5   :  { %v1006_v15 = vld [vmem:[%s1579_s0 + $0x60] sm:$0xff]  ;;  %v842_v16 = vpack.c.bf16 %v518_v14, %v517_v13  ;;  %v845_v20 = vpack.c.bf16 %v520_v18, %v519_v17  ;;  %v522_v22 = vld [vmem:[%s1580_s1 + $0x48] sm:$0xff]  ;;  %v523_v26 = vld [vmem:[%s1580_s1 + $0x50] sm:$0xff]  ;;  %v1179_v61 = vadd.s32 128, %v1173_v58 }
   0x6   :  { %253 = vperm.xlu0 %893, %v964_v3   ;;  %138 = vperm.xlu1 %892, %v969_v4   ;;  %v521_v21 = vld [vmem:[%s1580_s1 + $0x40] sm:$0xff]  ;;  %v1029_v24 = vld [vmem:[%s1579_s0 + $0x8] sm:$0xff]  ;;  %v524_v27 = vld [vmem:[%s1580_s1 + $0x58] sm:$0xff] }
   0x7   :  { %837 = vmatpush1.bf16.msra.mxu0 %v836_v9  ;;  %875 = vmatpush1.bf16.msra.mxu1 %v836_v9  ;;  %v848_v25 = vpack.c.bf16 %v522_v22, %v521_v21  ;;  %v16_v28 = vld [vmem:[%s1579_s0 + $0x10] sm:$0xff]  ;;  %v851_v29 = vpack.c.bf16 %v524_v27, %v523_v26  ;;  %v525_v30 = vld [vmem:[%s1580_s1 + $0x60] sm:$0xff]  ;;  %v526_v31 = vld [vmem:[%s1580_s1 + $0x68] sm:$0xff] }
   0x8   :  { %838 = vmatprep.subr.bf16.mxu0 %v931_v5  ;;  %866 = vmatprep.subr.bf16.mxu1 %v931_v5  ;;  %v1058_v32 = vld [vmem:[%s1579_s0 + $0x58] sm:$0xff]  ;;  %v854_v33 = vpack.c.bf16 %v526_v31, %v525_v30  ;;  %v527_v34 = vld [vmem:[%s1580_s1 + $0x70] sm:$0xff]  ;;  %v1074_v36 = vld [vmem:[%s1579_s0 + $0x28] sm:$0xff] }
   0x9   :  { %v528_v35 = vld [vmem:[%s1580_s1 + $0x78] sm:$0xff]  ;;  %v529_v38 = vld [vmem:[%s1580_s1 + $0x80] sm:$0xff]  ;;  %v530_v39 = vld [vmem:[%s1580_s1 + $0x88] sm:$0xff] }
   0xa   :  { %235 = vperm.xlu0 %893, %v990_v11   ;;  %894 = vset.pattern.permute.xlu1 %v929_v0  ;;  %v857_v37 = vpack.c.bf16 %v528_v35, %v527_v34  ;;  %v1089_v40 = vld [vmem:[%s1579_s0 + $0x70] sm:$0xff]  ;;  %v860_v41 = vpack.c.bf16 %v530_v39, %v529_v38  ;;  %v532_v43 = vld [vmem:[%s1580_s1 + $0x98] sm:$0xff]  ;;  %v18_v46 = vld [vmem:[%s1579_s0 + $0x20] sm:$0xff] }
   0xb   :  { %250 = vperm.xlu1 %894, %v969_v4   ;;  %840 = vmatpush1.bf16.msra.mxu0 %v839_v12  ;;  %v531_v42 = vld [vmem:[%s1580_s1 + $0x90] sm:$0xff]  ;;  %v27_v47 = vld [vmem:[%s1579_s0 + $0x68] sm:$0xff]  ;;  %v1133_v48 = vld [vmem:[%s1579_s0 + $0x38] sm:$0xff] }
   0xc   :  { %876 = vmatpush1.bf16.msra.mxu1 %v839_v12  ;;  %841 = vmatprep.subr.bf16.mxu0 %v931_v5  ;;  %v863_v44 = vpack.c.bf16 %v532_v43, %v531_v42  ;;  %v24_v45 = vld [vmem:[%s1579_s0 + $0x50] sm:$0xff]  ;;  %v1149_v50 = vld [vmem:[%s1579_s0 + $0x78] sm:$0xff] }
   0xd   :  { %867 = vmatprep.subr.bf16.mxu1 %v931_v5  ;;  %v1140_v49 = vld [vmem:[%s1579_s0 + $0x30] sm:$0xff] }
   0xe   :  { %262 = vperm.xlu0 %893, %v1006_v15  }
   0xf   :  { %895 = vset.pattern.permute.xlu1 %v932_v19  ;;  %843 = vmatpush1.bf16.msra.mxu0 %v842_v16 }
  0x10   :  { %338 = vperm.xlu1 %895, %v14_v2   ;;  %844 = vmatprep.subr.bf16.mxu0 %v931_v5 }
  0x11   :  { %877 = vmatpush1.bf16.msra.mxu1 %v842_v16 }
  0x12   :  { %911 = vset.pattern.permute.xlu0 %v933_v23  ;;  %868 = vmatprep.subr.bf16.mxu1 %v931_v5 }
  0x13   :  { %34 = vperm.xlu0 %911, %v14_v2   ;;  %846 = vmatpush1.bf16.msra.mxu0 %v845_v20 }
  0x14   :  { %896 = vset.pattern.permute.xlu1 %v933_v23  ;;  %847 = vmatprep.subr.bf16.mxu0 %v931_v5 }
  0x15   :  { %37 = vperm.xlu1 %896, %v1029_v24   ;;  %878 = vmatpush1.bf16.msra.mxu1 %v845_v20 }
  0x16   :  { %869 = vmatprep.subr.bf16.mxu1 %v931_v5 }
  0x17   :  { %58 = vperm.xlu0 %911, %v969_v4   ;;  %849 = vmatpush1.bf16.msra.mxu0 %v848_v25 }
  0x18   :  { %850 = vmatprep.subr.bf16.mxu0 %v931_v5 }
  0x19   :  { %61 = vperm.xlu1 %896, %v964_v3   ;;  %879 = vmatpush1.bf16.msra.mxu1 %v848_v25 }
  0x1a   :  { %870 = vmatprep.subr.bf16.mxu1 %v931_v5 }
  0x1b   :  { %40 = vperm.xlu0 %911, %v16_v28   ;;  %852 = vmatpush1.bf16.msra.mxu0 %v851_v29 }
  0x1c   :  { %853 = vmatprep.subr.bf16.mxu0 %v931_v5 }
  0x1d   :  { %897 = vset.pattern.permute.xlu1 %v930_v1  ;;  %880 = vmatpush1.bf16.msra.mxu1 %v851_v29 }
  0x1e   :  { %141 = vperm.xlu1 %897, %v964_v3   ;;  %871 = vmatprep.subr.bf16.mxu1 %v931_v5 }
  0x1f   :  { %67 = vperm.xlu0 %911, %v1058_v32   ;;  %855 = vmatpush1.bf16.msra.mxu0 %v854_v33 }
  0x20   :  { %856 = vmatprep.subr.bf16.mxu0 %v931_v5 }
  0x21   :  { %881 = vmatpush1.bf16.msra.mxu1 %v854_v33 }
  0x22   :  { %898 = vset.pattern.permute.xlu1 %v929_v0  ;;  %872 = vmatprep.subr.bf16.mxu1 %v931_v5 }
  0x23   :  { %49 = vperm.xlu0 %911, %v1074_v36   ;;  %229 = vperm.xlu1 %898, %v1029_v24  }
  0x24   :  { %858 = vmatpush1.bf16.msra.mxu0 %v857_v37 }
  0x25   :  { %859 = vmatprep.subr.bf16.mxu0 %v931_v5  ;;  %882 = vmatpush1.bf16.msra.mxu1 %v857_v37 }
  0x26   :  { %873 = vmatprep.subr.bf16.mxu1 %v931_v5 }
  0x27   :  { %76 = vperm.xlu0 %911, %v1089_v40   ;;  %899 = vset.pattern.permute.xlu1 %v932_v19 }
  0x28   :  { %341 = vperm.xlu1 %899, %v1029_v24   ;;  %861 = vmatpush1.bf16.msra.mxu0 %v860_v41 }
  0x29   :  { %862 = vmatprep.subr.bf16.mxu0 %v931_v5  ;;  %883 = vmatpush1.bf16.msra.mxu1 %v860_v41 }
  0x2a   :  { %874 = vmatprep.subr.bf16.mxu1 %v931_v5  ;;  %v934_v5 = vmov 0.0  }
  0x2b   :  { %918 = vset.pattern.permute.xlu0 %v932_v19 }
  0x2c   :  { %362 = vperm.xlu0 %918, %v969_v4   ;;  %365 = vperm.xlu1 %899, %v964_v3  }
  0x2d   :  { %864 = vmatpush1.bf16.msra.mxu0 %v863_v44  ;;  %884 = vmatpush1.bf16.msra.mxu1 %v863_v44 }
  0x30   :  { %344 = vperm.xlu0 %918, %v16_v28   ;;  %900 = vset.pattern.permute.xlu1 %v933_v23 }
  0x31   :  { %64 = vperm.xlu1 %900, %v24_v45  }
  0x34   :  { %371 = vperm.xlu0 %918, %v1058_v32  }
  0x35   :  { %901 = vset.pattern.permute.xlu1 %v930_v1 }
  0x36   :  { %120 = vperm.xlu1 %901, %v16_v28  }
  0x38   :  { %353 = vperm.xlu0 %918, %v1074_v36  }
  0x3a   :  { %902 = vset.pattern.permute.xlu1 %v929_v0 }
  0x3b   :  { %232 = vperm.xlu1 %902, %v16_v28  }
  0x3c   :  { %380 = vperm.xlu0 %918, %v1089_v40  }
  0x3f   :  { %256 = vperm.xlu1 %902, %v24_v45  }
  0x40   :  { %922 = vset.pattern.permute.xlu0 %v930_v1 }
  0x41   :  { %117 = vperm.xlu0 %922, %v1029_v24  }
  0x43   :  { %903 = vset.pattern.permute.xlu1 %v932_v19 }
  0x44   :  { %368 = vperm.xlu1 %903, %v24_v45  }
  0x45   :  { %144 = vperm.xlu0 %922, %v24_v45  }
  0x48   :  { %904 = vset.pattern.permute.xlu1 %v933_v23 }
  0x49   :  { %43 = vperm.xlu1 %904, %v990_v11   ;;  %126 = vperm.xlu0 %922, %v18_v46  }
  0x4d   :  { %905 = vset.pattern.permute.xlu1 %v930_v1  ;;  %153 = vperm.xlu0 %922, %v27_v47  }
  0x4e   :  { %123 = vperm.xlu1 %905, %v990_v11  }
  0x51   :  { %135 = vperm.xlu0 %922, %v1133_v48  }
  0x52   :  { %147 = vperm.xlu1 %905, %v1058_v32  }
  0x55   :  { %924 = vset.pattern.permute.xlu0 %v929_v0 }
  0x56   :  { %906 = vset.pattern.permute.xlu1 %v929_v0  ;;  %244 = vperm.xlu0 %924, %v1140_v49  }
  0x57   :  { %259 = vperm.xlu1 %906, %v1058_v32  }
  0x5a   :  { %271 = vperm.xlu0 %924, %v1149_v50  }
  0x5b   :  { %907 = vset.pattern.permute.xlu1 %v932_v19 }
  0x5c   :  { %347 = vperm.xlu1 %907, %v990_v11  }
  0x5e   :  { %928 = vset.pattern.permute.xlu0 %v932_v19 }
  0x60   :  { %908 = vset.pattern.permute.xlu1 %v933_v23 }
  0x61   :  { %46 = vperm.xlu1 %908, %v18_v46  }
  0x65   :  { %70 = vperm.xlu1 %908, %v1006_v15  }
  0x69   :  { %909 = vset.pattern.permute.xlu1 %v930_v1 }
  0x6a   :  { %150 = vperm.xlu1 %909, %v1006_v15  }
  0x6e   :  { %910 = vset.pattern.permute.xlu1 %v929_v0 }
  0x6f   :  { %238 = vperm.xlu1 %910, %v18_v46  }
  0x73   :  { %912 = vset.pattern.permute.xlu1 %v932_v19 }
  0x74   :  { %350 = vperm.xlu1 %912, %v18_v46  }
  0x78   :  { %374 = vperm.xlu1 %912, %v1006_v15  }
  0x7c   :  { %913 = vset.pattern.permute.xlu1 %v933_v23 }
  0x7d   :  { %73 = vperm.xlu1 %913, %v27_v47  }
  0x81   :  { %914 = vset.pattern.permute.xlu1 %v930_v1  ;;  %v115_v51 = vpop.permute.xlu1 %114  ;;  %v227_v52 = vpop.permute.xlu0 %226 }
  0x82   :  { %129 = vperm.xlu1 %914, %v1074_v36   ;;  %vm162_vm2 = vcmp.eq.s32.totalorder %v1179_v61, %v115_v51  ;;  %vm274_vm3 = vcmp.eq.s32.totalorder %v1179_v61, %v227_v52  ;;  %vm161_vm4 = vcmp.eq.s32.totalorder %v1173_v58, %v115_v51  ;;  %vm273_vm6 = vcmp.eq.s32.totalorder %v1173_v58, %v227_v52 }
  0x85   :  { %v139_v53 = vpop.permute.xlu1 %138  ;;  %v1165_v54 = vpop.permute.xlu0 %253 }
  0x86   :  { %915 = vset.pattern.permute.xlu1 %v929_v0 }
  0x87   :  { %241 = vperm.xlu1 %915, %v1074_v36  }
  0x89   :  { %v1169_v56 = vpop.permute.xlu0 %235 }
  0x8a   :  { %v1171_v57 = vpop.permute.xlu1 %250 }
  0x8b   :  { %265 = vperm.xlu1 %915, %v27_v47  }
  0x8d   :  { %v1175_v59 = vpop.permute.xlu0 %262 }
  0x8f   :  { %916 = vset.pattern.permute.xlu1 %v932_v19  ;;  %v339_v60 = vpop.permute.xlu1 %338 }
  0x90   :  { %377 = vperm.xlu1 %916, %v27_v47   ;;  %vm386_vm9 = vcmp.eq.s32.totalorder %v1179_v61, %v339_v60  ;;  %vm385_vm13 = vcmp.eq.s32.totalorder %v1173_v58, %v339_v60 }
  0x92   :  { %v35_v62 = vpop.permute.xlu0 %34 }
  0x93   :  { %vm81_vm0 = vcmp.eq.s32.totalorder %v1173_v58, %v35_v62  ;;  %vm82_vm1 = vcmp.eq.s32.totalorder %v1179_v61, %v35_v62 }
  0x94   :  { %917 = vset.pattern.permute.xlu1 %v933_v23  ;;  %v1186_v63 = vpop.permute.xlu1 %37  ;;  %vm194_vm5 = vmor %vm82_vm1, %vm162_vm2  ;;  %vm177_vm1 = vcmp.eq.s32.totalorder %v1173_v58, %v139_v53 }
  0x95   :  { %52 = vperm.xlu1 %917, %v1140_v49   ;;  %vm193_vm7 = vmor %vm81_vm0, %vm161_vm4 }
  0x96   :  { %v59_v2 = vpop.permute.xlu0 %58  ;;  %vm306_vm8 = vmor %vm194_vm5, %vm274_vm3  ;;  %vm178_vm3 = vcmp.eq.s32.totalorder %v1179_v61, %v139_v53 }
  0x97   :  { %vm305_vm10 = vmor %vm193_vm7, %vm273_vm6  ;;  %vm97_vm15 = vcmp.eq.s32.totalorder %v1173_v58, %v59_v2  ;;  %vm98_vm0 = vcmp.eq.s32.totalorder %v1179_v61, %v59_v2  ;;  %vm292_vm7 = vcmp.eq.s32.totalorder %v1179_v61, %v1165_v54 }
  0x98   :  { %v62_v3 = vpop.permute.xlu1 %61  ;;  %vm418_vm12 = vmor %vm306_vm8, %vm386_vm9  ;;  %vm289_vm8 = vcmp.eq.s32.totalorder %v1173_v58, %v1171_v57 }
  0x99   :  { %919 = vset.pattern.permute.xlu1 %v930_v1  ;;  %v771_v6 = vsel %vm418_vm12, 1.0, %v934_v5  ;;  %vm417_vm14 = vmor %vm305_vm10, %vm385_vm13  ;;  %vm100_vm6 = vcmp.eq.s32.totalorder %v1179_v61, %v62_v3  ;;  %vm290_vm10 = vcmp.eq.s32.totalorder %v1179_v61, %v1171_v57 }
  0x9a   :  { %132 = vperm.xlu1 %919, %v1140_v49   ;;  %v1194_v4 = vpop.permute.xlu0 %40  ;;  %803 = vmatprep.mubr.msk.f32.mxu0 %vm1583_vm11, %v771_v6  ;;  %vm209_vm4 = vmor %vm97_vm15, %vm177_vm1 }
  0x9b   :  { %804 = vmatmul.mubr.msk.f32.vlgmr.msra.gmra.mrb[0].mxu0 %vm417_vm14, %v935_v7  ;;  %vm210_vm5 = vmor %vm98_vm0, %vm178_vm3 }
  0x9c   :  { %vm1227_vm12 = vmor %vm209_vm4, %vm289_vm8  ;;  %vm99_vm4 = vcmp.eq.s32.totalorder %v1173_v58, %v62_v3 }
  0x9d   :  { %v142_v8 = vpop.permute.xlu1 %141  ;;  %vm322_vm15 = vmor %vm210_vm5, %vm290_vm10  ;;  %vm291_vm5 = vcmp.eq.s32.totalorder %v1173_v58, %v1165_v54 }
  0x9e   :  { %156 = vperm.xlu1 %919, %v1089_v40   ;;  %v1201_v9 = vpop.permute.xlu0 %67  ;;  %vm180_vm2 = vcmp.eq.s32.totalorder %v1179_v61, %v142_v8  ;;  %vm179_vm0 = vcmp.eq.s32.totalorder %v1173_v58, %v142_v8 }
  0x9f   :  { %vm212_vm9 = vmor %vm100_vm6, %vm180_vm2 }
  0xa0   :  { %vm324_vm1 = vmor %vm212_vm9, %vm292_vm7 }
  0xa1   :  { %vm211_vm8 = vmor %vm99_vm4, %vm179_vm0  ;;  %vm85_vm4 = vcmp.eq.s32.totalorder %v1173_v58, %v1194_v4 }
  0xa2   :  { %920 = vset.pattern.permute.xlu1 %v929_v0  ;;  %v1204_v10 = vpop.permute.xlu1 %229  ;;  %v1206_v11 = vpop.permute.xlu0 %49  ;;  %vm323_vm10 = vmor %vm211_vm8, %vm291_vm5 }
  0xa3   :  { %268 = vperm.xlu1 %920, %v1089_v40  }
  0xa6   :  { %v1210_v12 = vpop.permute.xlu0 %76 }
  0xa7   :  { %921 = vset.pattern.permute.xlu1 %v932_v19  ;;  %v1214_v13 = vpop.permute.xlu1 %341 }
  0xa8   :  { %356 = vperm.xlu1 %921, %v1140_v49  }
  0xab   :  { %v363_v14 = vpop.permute.xlu0 %362  ;;  %v366_v15 = vpop.permute.xlu1 %365 }
  0xac   :  { %vm404_vm13 = vcmp.eq.s32.totalorder %v1179_v61, %v366_v15  ;;  %923 = vset.pattern.permute.xlu1 %v933_v23  ;;  %vm402_vm14 = vcmp.eq.s32.totalorder %v1179_v61, %v363_v14  ;;  %vm401_vm2 = vcmp.eq.s32.totalorder %v1173_v58, %v363_v14  ;;  %vm403_vm9 = vcmp.eq.s32.totalorder %v1173_v58, %v366_v15 }
  0xad   :  { %55 = vperm.xlu1 %923, %v1133_v48   ;;  %vm436_vm3 = vmor %vm324_vm1, %vm404_vm13 }
  0xae   :  { %vm434_vm6 = vmor %vm322_vm15, %vm402_vm14  ;;  %v789_v21 = vsel %vm436_vm3, 1.0, %v934_v5  ;;  %vm83_vm3 = vcmp.eq.s32.totalorder %v1173_v58, %v1186_v63 }
  0xaf   :  { %v1237_v17 = vpop.permute.xlu0 %344  ;;  %v787_v20 = vsel %vm434_vm6, 1.0, %v934_v5  ;;  %vm433_vm7 = vmor %vm1227_vm12, %vm401_vm2  ;;  %vm86_vm12 = vcmp.eq.s32.totalorder %v1179_v61, %v1194_v4 }
  0xb0   :  { %v65_v18 = vpop.permute.xlu1 %64  ;;  %819 = vmatprep.mubr.msk.f32.mxu1 %vm1583_vm11, %v787_v20  ;;  %vm435_vm13 = vmor %vm323_vm10, %vm403_vm9  ;;  %vm390_vm1 = vcmp.eq.s32.totalorder %v1179_v61, %v1237_v17 }
  0xb1   :  { %79 = vperm.xlu1 %923, %v1149_v50   ;;  %820 = vmatmul.mubr.msk.f32.vlgmr.msra.gmra.mrb[0].mxu1 %vm433_vm7, %v935_v7  ;;  %vm84_vm7 = vcmp.eq.s32.totalorder %v1179_v61, %v1186_v63 }
  0xb2   :  { %821 = vmatprep.mubr.msk.f32.mxu1 %vm1583_vm11, %v789_v21  ;;  %vm387_vm11 = vcmp.eq.s32.totalorder %v1173_v58, %v1214_v13  ;;  %v1615_v21 = vmov 0 }
  0xb3   :  { %v1250_v22 = vpop.permute.xlu0 %371 }
  0xb5   :  { %925 = vset.pattern.permute.xlu1 %v930_v1  ;;  %v121_v23 = vpop.permute.xlu1 %120  ;;  %822 = vmatmul.mubr.msk.f32.gmra.mrb[2].mxu1 %vm435_vm13, %v935_v7  ;;  %vm275_vm13 = vcmp.eq.s32.totalorder %v1173_v58, %v1204_v10 }
  0xb6   :  { %159 = vperm.xlu1 %925, %v1149_v50   ;;  %vm166_vm14 = vcmp.eq.s32.totalorder %v1179_v61, %v121_v23  ;;  %vm165_vm6 = vcmp.eq.s32.totalorder %v1173_v58, %v121_v23 }
  0xb7   :  { %v1256_v24 = vpop.permute.xlu0 %353  ;;  %vm198_vm0 = vmor %vm86_vm12, %vm166_vm14  ;;  %vm276_vm14 = vcmp.eq.s32.totalorder %v1179_v61, %v1204_v10 }
  0xba   :  { %926 = vset.pattern.permute.xlu1 %v929_v0  ;;  %v233_v25 = vpop.permute.xlu1 %232 }
  0xbb   :  { %247 = vperm.xlu1 %926, %v1133_v48   ;;  %v1263_v26 = vpop.permute.xlu0 %380  ;;  %vm278_vm15 = vcmp.eq.s32.totalorder %v1179_v61, %v233_v25 }
  0xbc   :  { %vm310_vm2 = vmor %vm198_vm0, %vm278_vm15 }
  0xbd   :  { %vm1279_vm9 = vmor %vm310_vm2, %vm390_vm1  ;;  %vm101_vm1 = vcmp.eq.s32.totalorder %v1173_v58, %v65_v18 }
  0xbe   :  { %v257_v1 = vpop.permute.xlu1 %256  ;;  %vm1287_vm15 = vmor %vm85_vm4, %vm165_vm6 }
  0xbf   :  { %927 = vset.pattern.permute.xlu1 %v932_v19  ;;  %v1586_v19 = vmov 0  ;;  %vm293_vm6 = vcmp.eq.s32.totalorder %v1173_v58, %v257_v1 }
  0xc0   :  { %v118_v0 = vpop.permute.xlu0 %117  ;;  %359 = vperm.xlu1 %927, %v1133_v48   ;;  %v1587_v19 = vsel %vm1279_vm9, 4294967295, %v1586_v19  ;;  %vm277_vm9 = vcmp.eq.s32.totalorder %v1173_v58, %v233_v25 }
  0xc1   :  { %vm163_vm8 = vcmp.eq.s32.totalorder %v1173_v58, %v118_v0  ;;  %vm164_vm5 = vcmp.eq.s32.totalorder %v1179_v61, %v118_v0 }
  0xc2   :  { %vm195_vm10 = vmor %vm83_vm3, %vm163_vm8 }
  0xc3   :  { %vm196_vm12 = vmor %vm84_vm7, %vm164_vm5  ;;  %v369_v27 = vpop.permute.xlu1 %368  ;;  %vm102_vm5 = vcmp.eq.s32.totalorder %v1179_v61, %v65_v18 }
  0xc4   :  { %vm1291_vm0 = vmor %vm195_vm10, %vm275_vm13  ;;  %v145_v30 = vpop.permute.xlu0 %144  ;;  %383 = vperm.xlu1 %927, %v1149_v50   ;;  %vm294_vm10 = vcmp.eq.s32.totalorder %v1179_v61, %v257_v1 }
  0xc5   :  { %vm308_vm2 = vmor %vm196_vm12, %vm276_vm14  ;;  %vm181_vm3 = vcmp.eq.s32.totalorder %v1173_v58, %v145_v30  ;;  %vm182_vm8 = vcmp.eq.s32.totalorder %v1179_v61, %v145_v30  ;;  %vm388_vm12 = vcmp.eq.s32.totalorder %v1179_v61, %v1214_v13 }
  0xc6   :  { %vm213_vm4 = vmor %vm101_vm1, %vm181_vm3  ;;  %vm406_vm3 = vcmp.eq.s32.totalorder %v1179_v61, %v369_v27 }
  0xc7   :  { %vm214_vm7 = vmor %vm102_vm5, %vm182_vm8  ;;  %vm1594_vm5 = vcmask 261120  }
  0xc8   :  { %vm1302_vm13 = vmor %vm213_vm4, %vm293_vm6  ;;  %v44_v32 = vpop.permute.xlu1 %43  ;;  %vm389_vm6 = vcmp.eq.s32.totalorder %v1173_v58, %v1237_v17  ;;  %v127_v46 = vpop.permute.xlu0 %126 }
  0xc9   :  { %vm326_vm14 = vmor %vm214_vm7, %vm294_vm10  ;;  %vm405_vm10 = vcmp.eq.s32.totalorder %v1173_v58, %v369_v27 }
  0xca   :  { %vm420_vm1 = vmor %vm308_vm2, %vm388_vm12  ;;  %vm1595_vm2 = vnez %v1587_v19 }
  0xcb   :  { %v773_v33 = vsel %vm420_vm1, 1.0, %v934_v5  ;;  %vm419_vm8 = vmor %vm1291_vm0, %vm387_vm11  ;;  %v775_v34 = vsel %vm1595_vm2, 1.0, %v934_v5 }
  0xcc   :  { %805 = vmatprep.mubr.msk.f32.mxu0 %vm1594_vm5, %v773_v33  ;;  %vm438_vm4 = vmor %vm326_vm14, %vm406_vm3  ;;  %vm103_vm14 = vcmp.eq.s32.totalorder %v1173_v58, %v1201_v9  ;;  %vm104_vm3 = vcmp.eq.s32.totalorder %v1179_v61, %v1201_v9  ;;  %v154_v57 = vpop.permute.xlu0 %153 }
  0xcd   :  { %vm309_vm7 = vmor %vm1287_vm15, %vm277_vm9  ;;  %806 = vmatmul.mubr.msk.f32.gmra.mrb[2].mxu0 %vm419_vm8, %v935_v7  ;;  %v791_v35 = vsel %vm438_vm4, 1.0, %v934_v5  ;;  %v124_v36 = vpop.permute.xlu1 %123  ;;  %vm88_vm8 = vcmp.eq.s32.totalorder %v1179_v61, %v44_v32 }
  0xce   :  { %vm1596_vm11 = vmmov %vm1594_vm5  ;;  %vm168_vm15 = vcmp.eq.s32.totalorder %v1179_v61, %v124_v36 }
  0xcf   :  { %807 = vmatprep.mubr.msk.f32.mxu0 %vm1596_vm11, %v775_v34  ;;  %vm1597_vm0 = vmmov %vm1594_vm5  ;;  %vm167_vm11 = vcmp.eq.s32.totalorder %v1173_v58, %v124_v36 }
  0xd0   :  { %823 = vmatprep.mubr.msk.f32.mxu1 %vm1597_vm0, %v791_v35  ;;  %vm437_vm12 = vmor %vm1302_vm13, %vm405_vm10  ;;  %v136_v4 = vpop.permute.xlu0 %135 }
  0xd1   :  { %824 = vmatmul.mubr.msk.f32.gmra.mrb[4].mxu1 %vm437_vm12, %v935_v7  ;;  %vm421_vm9 = vmor %vm309_vm7, %vm389_vm6  ;;  %v148_v37 = vpop.permute.xlu1 %147  ;;  %vm408_vm6 = vcmp.eq.s32.totalorder %v1179_v61, %v1250_v22  ;;  %vm407_vm12 = vcmp.eq.s32.totalorder %v1173_v58, %v1250_v22 }
  0xd2   :  { %808 = vmatmul.mubr.msk.f32.gmra.mrb[4].mxu0 %vm421_vm9, %v935_v7  ;;  %vm183_vm1 = vcmp.eq.s32.totalorder %v1173_v58, %v148_v37  ;;  %vm184_vm13 = vcmp.eq.s32.totalorder %v1179_v61, %v148_v37  ;;  %vm1340_vm5 = vmor %vm88_vm8, %vm168_vm15  ;;  %vm280_vm15 = vcmp.eq.s32.totalorder %v1179_v61, %v1169_v56 }
  0xd3   :  { %vm215_vm4 = vmor %vm103_vm14, %vm183_vm1  ;;  %vm87_vm14 = vcmp.eq.s32.totalorder %v1173_v58, %v44_v32 }
  0xd4   :  { %vm216_vm7 = vmor %vm104_vm3, %vm184_vm13  ;;  %vm279_vm3 = vcmp.eq.s32.totalorder %v1173_v58, %v1169_v56  ;;  %vm1600_vm13 = vcmask 261120  }
  0xd5   :  { %vm199_vm8 = vmor %vm87_vm14, %vm167_vm11  ;;  %v245_v10 = vpop.permute.xlu0 %244 }
  0xd6   :  { %v260_v39 = vpop.permute.xlu1 %259  ;;  %vm311_vm11 = vmor %vm199_vm8, %vm279_vm3 }
  0xd7   :  { %vm295_vm10 = vcmp.eq.s32.totalorder %v1173_v58, %v260_v39  ;;  %vm296_vm2 = vcmp.eq.s32.totalorder %v1179_v61, %v260_v39  ;;  %vm1601_vm14 = vmmov %vm1600_vm13 }
  0xd8   :  { %vm327_vm0 = vmor %vm215_vm4, %vm295_vm10 }
  0xd9   :  { %vm328_vm9 = vmor %vm216_vm7, %vm296_vm2  ;;  %v272_v20 = vpop.permute.xlu0 %271 }
  0xda   :  { %vm440_vm1 = vmor %vm328_vm9, %vm408_vm6 }
  0xdb   :  { %v793_v40 = vsel %vm440_vm1, 1.0, %v934_v5  ;;  %v348_v41 = vpop.permute.xlu1 %347  ;;  %vm439_vm10 = vmor %vm327_vm0, %vm407_vm12  ;;  %vm169_vm0 = vcmp.eq.s32.totalorder %v1173_v58, %v127_v46  ;;  %vm170_vm12 = vcmp.eq.s32.totalorder %v1179_v61, %v127_v46 }
  0xdc   :  { %825 = vmatprep.mubr.msk.f32.mxu1 %vm1600_vm13, %v793_v40  ;;  %vm392_vm4 = vcmp.eq.s32.totalorder %v1179_v61, %v348_v41  ;;  %vm312_vm7 = vmor %vm1340_vm5, %vm280_vm15  ;;  %vm391_vm2 = vcmp.eq.s32.totalorder %v1173_v58, %v348_v41 }
  0xdd   :  { %826 = vmatmul.mubr.msk.f32.gmra.mrb[6].mxu1 %vm439_vm10, %v935_v7  ;;  %vm424_vm6 = vmor %vm312_vm7, %vm392_vm4 }
  0xde   :  { %v777_v42 = vsel %vm424_vm6, 1.0, %v934_v5  ;;  %vm423_vm9 = vmor %vm311_vm11, %vm391_vm2 }
  0xdf   :  { %809 = vmatprep.mubr.msk.f32.mxu0 %vm1601_vm14, %v777_v42 }
  0xe0   :  { %v47_v43 = vpop.permute.xlu1 %46  ;;  %810 = vmatmul.mubr.msk.f32.gmra.mrb[6].mxu0 %vm423_vm9, %v935_v7 }
  0xe1   :  { %vm89_vm5 = vcmp.eq.s32.totalorder %v1173_v58, %v47_v43  ;;  %vm90_vm15 = vcmp.eq.s32.totalorder %v1179_v61, %v47_v43 }
  0xe2   :  { %vm1371_vm8 = vmor %vm89_vm5, %vm169_vm0  ;;  %vm298_vm5 = vcmp.eq.s32.totalorder %v1179_v61, %v1175_v59 }
  0xe3   :  { %vm202_vm13 = vmor %vm90_vm15, %vm170_vm12 }
  0xe4   :  { %v71_v44 = vpop.permute.xlu1 %70 }
  0xe5   :  { %vm105_vm4 = vcmp.eq.s32.totalorder %v1173_v58, %v71_v44  ;;  %vm106_vm7 = vcmp.eq.s32.totalorder %v1179_v61, %v71_v44 }
  0xe9   :  { %v151_v45 = vpop.permute.xlu1 %150 }
  0xea   :  { %vm185_vm1 = vcmp.eq.s32.totalorder %v1173_v58, %v151_v45  ;;  %vm186_vm3 = vcmp.eq.s32.totalorder %v1179_v61, %v151_v45 }
  0xeb   :  { %vm1379_vm2 = vmor %vm105_vm4, %vm185_vm1  ;;  %vm297_vm1 = vcmp.eq.s32.totalorder %v1173_v58, %v1175_v59  ;;  %vm1606_vm4 = vcmask 261120  }
  0xec   :  { %vm218_vm6 = vmor %vm106_vm7, %vm186_vm3 }
  0xee   :  { %v239_v47 = vpop.permute.xlu1 %238 }
  0xef   :  { %vm282_vm10 = vcmp.eq.s32.totalorder %v1179_v61, %v239_v47  ;;  %vm281_vm11 = vcmp.eq.s32.totalorder %v1173_v58, %v239_v47 }
  0xf0   :  { %vm314_vm14 = vmor %vm202_vm13, %vm282_vm10 }
  0xf1   :  { %vm313_vm15 = vmor %vm1371_vm8, %vm281_vm11 }
  0xf2   :  { %vm330_vm10 = vmor %vm218_vm6, %vm298_vm5  ;;  %vm91_vm5 = vcmp.eq.s32.totalorder %v1173_v58, %v1206_v11 }
  0xf3   :  { %v351_v50 = vpop.permute.xlu1 %350  ;;  %vm329_vm8 = vmor %vm1379_vm2, %vm297_vm1 }
  0xf4   :  { %vm394_vm9 = vcmp.eq.s32.totalorder %v1179_v61, %v351_v50  ;;  %vm393_vm0 = vcmp.eq.s32.totalorder %v1173_v58, %v351_v50 }
  0xf5   :  { %vm426_vm12 = vmor %vm314_vm14, %vm394_vm9 }
  0xf6   :  { %v779_v51 = vsel %vm426_vm12, 1.0, %v934_v5  ;;  %vm425_vm3 = vmor %vm313_vm15, %vm393_vm0  ;;  %vm92_vm12 = vcmp.eq.s32.totalorder %v1179_v61, %v1206_v11  ;;  %vm396_vm15 = vcmp.eq.s32.totalorder %v1179_v61, %v1256_v24 }
  0xf7   :  { %v375_v52 = vpop.permute.xlu1 %374  ;;  %811 = vmatprep.mubr.msk.f32.mxu0 %vm1606_vm4, %v779_v51  ;;  %vm1607_vm14 = vmmov %vm1606_vm4 }
  0xf8   :  { %vm410_vm13 = vcmp.eq.s32.totalorder %v1179_v61, %v375_v52  ;;  %vm409_vm7 = vcmp.eq.s32.totalorder %v1173_v58, %v375_v52  ;;  %812 = vmatmul.mubr.msk.f32.gmra.mrb[8].mxu0 %vm425_vm3, %v935_v7 }
  0xf9   :  { %vm442_vm9 = vmor %vm330_vm10, %vm410_vm13  ;;  %vm395_vm13 = vcmp.eq.s32.totalorder %v1173_v58, %v1256_v24 }
  0xfa   :  { %v795_v53 = vsel %vm442_vm9, 1.0, %v934_v5  ;;  %vm441_vm11 = vmor %vm329_vm8, %vm409_vm7 }
  0xfb   :  { %827 = vmatprep.mubr.msk.f32.mxu1 %vm1607_vm14, %v795_v53 }
  0xfc   :  { %v74_v54 = vpop.permute.xlu1 %73  ;;  %828 = vmatmul.mubr.msk.f32.gmra.mrb[8].mxu1 %vm441_vm11, %v935_v7  ;;  %vm187_vm11 = vcmp.eq.s32.totalorder %v1173_v58, %v154_v57 }
  0xfd   :  { %vm107_vm14 = vcmp.eq.s32.totalorder %v1173_v58, %v74_v54 }
 0x101   :  { %v130_v55 = vpop.permute.xlu1 %129 }
 0x102   :  { %vm171_vm0 = vcmp.eq.s32.totalorder %v1173_v58, %v130_v55  ;;  %vm172_vm6 = vcmp.eq.s32.totalorder %v1179_v61, %v130_v55 }
 0x103   :  { %vm203_vm2 = vmor %vm91_vm5, %vm171_vm0  ;;  %vm1608_vm0 = vcmask 261120   ;;  %vm108_vm5 = vcmp.eq.s32.totalorder %v1179_v61, %v74_v54 }
 0x104   :  { %vm204_vm1 = vmor %vm92_vm12, %vm172_vm6  ;;  %vm188_vm6 = vcmp.eq.s32.totalorder %v1179_v61, %v154_v57 }
 0x106   :  { %v242_v56 = vpop.permute.xlu1 %241 }
 0x107   :  { %vm283_vm3 = vcmp.eq.s32.totalorder %v1173_v58, %v242_v56  ;;  %vm284_vm4 = vcmp.eq.s32.totalorder %v1179_v61, %v242_v56 }
 0x108   :  { %vm315_vm10 = vmor %vm203_vm2, %vm283_vm3 }
 0x109   :  { %vm316_vm7 = vmor %vm204_vm1, %vm284_vm4 }
 0x10a   :  { %vm428_vm9 = vmor %vm316_vm7, %vm396_vm15  ;;  %v266_v59 = vpop.permute.xlu1 %265 }
 0x10b   :  { %v781_v60 = vsel %vm428_vm9, 1.0, %v934_v5  ;;  %vm427_vm8 = vmor %vm315_vm10, %vm395_vm13  ;;  %vm300_vm12 = vcmp.eq.s32.totalorder %v1179_v61, %v266_v59  ;;  %vm299_vm1 = vcmp.eq.s32.totalorder %v1173_v58, %v266_v59 }
 0x10c   :  { %813 = vmatprep.mubr.msk.f32.mxu0 %vm1608_vm0, %v781_v60  ;;  %vm219_vm2 = vmor %vm107_vm14, %vm187_vm11 }
 0x10d   :  { %814 = vmatmul.mubr.msk.f32.gmra.mrb[10].mxu0 %vm427_vm8, %v935_v7  ;;  %vm220_vm15 = vmor %vm108_vm5, %vm188_vm6  ;;  %vm109_vm5 = vcmp.eq.s32.totalorder %v1173_v58, %v1210_v12 }
 0x10e   :  { %vm332_vm4 = vmor %vm220_vm15, %vm300_vm12 }
 0x10f   :  { %v378_v62 = vpop.permute.xlu1 %377  ;;  %vm331_vm7 = vmor %vm219_vm2, %vm299_vm1  ;;  %vm110_vm2 = vcmp.eq.s32.totalorder %v1179_v61, %v1210_v12 }
 0x110   :  { %vm412_vm3 = vcmp.eq.s32.totalorder %v1179_v61, %v378_v62  ;;  %vm411_vm13 = vcmp.eq.s32.totalorder %v1173_v58, %v378_v62 }
 0x111   :  { %vm444_vm10 = vmor %vm332_vm4, %vm412_vm3 }
 0x112   :  { %v797_v63 = vsel %vm444_vm10, 1.0, %v934_v5  ;;  %vm443_vm9 = vmor %vm331_vm7, %vm411_vm13  ;;  %vm414_vm10 = vcmp.eq.s32.totalorder %v1179_v61, %v1263_v26 }
 0x113   :  { %829 = vmatprep.mubr.msk.f32.mxu1 %vm1608_vm0, %v797_v63  ;;  %vm413_vm0 = vcmp.eq.s32.totalorder %v1173_v58, %v1263_v26 }
 0x114   :  { %v53_v2 = vpop.permute.xlu1 %52  ;;  %830 = vmatmul.mubr.msk.f32.gmra.mrb[10].mxu1 %vm443_vm9, %v935_v7 }
 0x115   :  { %vm94_vm14 = vcmp.eq.s32.totalorder %v1179_v61, %v53_v2 }
 0x119   :  { %v133_v3 = vpop.permute.xlu1 %132 }
 0x11a   :  { %vm174_vm8 = vcmp.eq.s32.totalorder %v1179_v61, %v133_v3  ;;  %vm173_vm7 = vcmp.eq.s32.totalorder %v1173_v58, %v133_v3 }
 0x11b   :  { %vm1434_vm12 = vmor %vm94_vm14, %vm174_vm8  ;;  %vm286_vm8 = vcmp.eq.s32.totalorder %v1179_v61, %v245_v10  ;;  %vm93_vm14 = vcmp.eq.s32.totalorder %v1173_v58, %v53_v2 }
 0x11d   :  { %v157_v6 = vpop.permute.xlu1 %156 }
 0x11e   :  { %vm189_vm11 = vcmp.eq.s32.totalorder %v1173_v58, %v157_v6  ;;  %vm190_vm6 = vcmp.eq.s32.totalorder %v1179_v61, %v157_v6 }
 0x11f   :  { %vm221_vm15 = vmor %vm109_vm5, %vm189_vm11 }
 0x120   :  { %vm222_vm1 = vmor %vm110_vm2, %vm190_vm6  ;;  %vm285_vm2 = vcmp.eq.s32.totalorder %v1173_v58, %v245_v10 }
 0x121   :  { %vm205_vm5 = vmor %vm93_vm14, %vm173_vm7  ;;  %vm176_vm14 = vcmp.eq.s32.totalorder %v1179_v61, %v136_v4 }
 0x122   :  { %v269_v9 = vpop.permute.xlu1 %268 }
 0x123   :  { %vm301_vm3 = vcmp.eq.s32.totalorder %v1173_v58, %v269_v9  ;;  %vm302_vm4 = vcmp.eq.s32.totalorder %v1179_v61, %v269_v9 }
 0x124   :  { %vm333_vm13 = vmor %vm221_vm15, %vm301_vm3  ;;  %vm1611_vm15 = vcmask 261120  }
 0x125   :  { %vm334_vm9 = vmor %vm222_vm1, %vm302_vm4 }
 0x126   :  { %vm446_vm11 = vmor %vm334_vm9, %vm414_vm10 }
 0x127   :  { %v799_v11 = vsel %vm446_vm11, 1.0, %v934_v5  ;;  %v357_v12 = vpop.permute.xlu1 %356  ;;  %vm445_vm6 = vmor %vm333_vm13, %vm413_vm0  ;;  %vm175_vm0 = vcmp.eq.s32.totalorder %v1173_v58, %v136_v4 }
 0x128   :  { %831 = vmatprep.mubr.msk.f32.mxu1 %vm1611_vm15, %v799_v11  ;;  %vm398_vm3 = vcmp.eq.s32.totalorder %v1179_v61, %v357_v12  ;;  %vm318_vm1 = vmor %vm1434_vm12, %vm286_vm8  ;;  %vm397_vm4 = vcmp.eq.s32.totalorder %v1173_v58, %v357_v12 }
 0x129   :  { %832 = vmatmul.mubr.msk.f32.gmra.mrb[12].mxu1 %vm445_vm6, %v935_v7  ;;  %vm430_vm10 = vmor %vm318_vm1, %vm398_vm3 }
 0x12a   :  { %vm317_vm9 = vmor %vm205_vm5, %vm285_vm2  ;;  %v783_v13 = vsel %vm430_vm10, 1.0, %v934_v5 }
 0x12b   :  { %vm429_vm11 = vmor %vm317_vm9, %vm397_vm4 }
 0x12c   :  { %vm1612_vm13 = vmmov %vm1611_vm15  ;;  %v56_v14 = vpop.permute.xlu1 %55 }
 0x12d   :  { %815 = vmatprep.mubr.msk.f32.mxu0 %vm1612_vm13, %v783_v13  ;;  %vm95_vm7 = vcmp.eq.s32.totalorder %v1173_v58, %v56_v14  ;;  %vm96_vm12 = vcmp.eq.s32.totalorder %v1179_v61, %v56_v14 }
 0x12e   :  { %816 = vmatmul.mubr.msk.f32.gmra.mrb[12].mxu0 %vm429_vm11, %v935_v7  ;;  %vm1465_vm6 = vmor %vm95_vm7, %vm175_vm0 }
 0x12f   :  { %vm208_vm2 = vmor %vm96_vm12, %vm176_vm14  ;;  %vm304_vm12 = vcmp.eq.s32.totalorder %v1179_v61, %v272_v20 }
 0x130   :  { %v80_v15 = vpop.permute.xlu1 %79 }
 0x131   :  { %vm111_vm15 = vcmp.eq.s32.totalorder %v1173_v58, %v80_v15  ;;  %vm112_vm1 = vcmp.eq.s32.totalorder %v1179_v61, %v80_v15 }
 0x135   :  { %v160_v16 = vpop.permute.xlu1 %159 }
 0x136   :  { %vm191_vm8 = vcmp.eq.s32.totalorder %v1173_v58, %v160_v16  ;;  %vm192_vm5 = vcmp.eq.s32.totalorder %v1179_v61, %v160_v16 }
 0x137   :  { %vm1473_vm4 = vmor %vm111_vm15, %vm191_vm8  ;;  %vm303_vm8 = vcmp.eq.s32.totalorder %v1173_v58, %v272_v20 }
 0x138   :  { %v1616_v21 = vsel %vm1473_vm4, 4294967295, %v1615_v21  ;;  %vm224_vm10 = vmor %vm112_vm1, %vm192_vm5  ;;  %vm1617_vm5 = vcmask 261120  }
 0x139   :  { %vm336_vm4 = vmor %vm224_vm10, %vm304_vm12 }
 0x13a   :  { %v248_v17 = vpop.permute.xlu1 %247 }
 0x13b   :  { %vm288_vm3 = vcmp.eq.s32.totalorder %v1179_v61, %v248_v17  ;;  %vm287_vm9 = vcmp.eq.s32.totalorder %v1173_v58, %v248_v17 }
 0x13c   :  { %vm320_vm13 = vmor %vm208_vm2, %vm288_vm3 }
 0x13d   :  { %vm319_vm14 = vmor %vm1465_vm6, %vm287_vm9 }
 0x13e   :  { %vm1619_vm9 = vmmov %vm1617_vm5 }
 0x13f   :  { %v360_v22 = vpop.permute.xlu1 %359 }
 0x140   :  { %vm400_vm11 = vcmp.eq.s32.totalorder %v1179_v61, %v360_v22  ;;  %vm399_vm7 = vcmp.eq.s32.totalorder %v1173_v58, %v360_v22 }
 0x141   :  { %vm432_vm0 = vmor %vm320_vm13, %vm400_vm11  ;;  %vm1618_vm11 = vnez %v1616_v21 }
 0x142   :  { %v785_v23 = vsel %vm432_vm0, 1.0, %v934_v5  ;;  %vm431_vm15 = vmor %vm319_vm14, %vm399_vm7 }
 0x143   :  { %v384_v24 = vpop.permute.xlu1 %383  ;;  %817 = vmatprep.mubr.msk.f32.mxu0 %vm1617_vm5, %v785_v23  ;;  %vm335_vm13 = vmor %vm1618_vm11, %vm303_vm8 }
 0x144   :  { %vm416_vm1 = vcmp.eq.s32.totalorder %v1179_v61, %v384_v24  ;;  %vm415_vm2 = vcmp.eq.s32.totalorder %v1173_v58, %v384_v24  ;;  %818 = vmatmul.mubr.msk.f32.gmra.mrb[14].mxu0 %vm431_vm15, %v935_v7  ;;  %v1497_v61 = vld [vmem:[%s1581_s2] ss:$0 sm:$0xff] }
 0x145   :  { %vm448_vm3 = vmor %vm336_vm4, %vm416_vm1 }
 0x146   :  { %v801_v25 = vsel %vm448_vm3, 1.0, %v934_v5  ;;  %vm447_vm6 = vmor %vm335_vm13, %vm415_vm2 }
 0x147   :  { %833 = vmatprep.mubr.msk.f32.mxu1 %vm1619_vm9, %v801_v25  ;;  %vm1620_vm4 = vmmov %vm1617_vm5 }
 0x148   :  { %834 = vmatmul.mubr.msk.f32.gmra.mrb[14].mxu1 %vm447_vm6, %v935_v7  ;;  %vm1621_vm10 = vmmov %vm1620_vm4 }
 0x149   :  { %vm1622_vm7 = vmmov %vm1620_vm4 }
 0x14a   :  { %vm1623_vm12 = vmmov %vm1620_vm4 }
 0x14b   :  { %vm1624_vm0 = vmmov %vm1620_vm4 }
 0x14c   :  { %vm1625_vm14 = vmmov %vm1624_vm0 }
 0x14d   :  { %vm1626_vm8 = vmmov %vm1624_vm0 }
 0x14e   :  { %vm1627_vm15 = vmmov %vm1624_vm0 }
 0x14f   :  { %vm1628_vm5 = vmmov %vm1624_vm0 }
 0x150   :  { %vm1629_vm1 = vmmov %vm1624_vm0 }
 0x151   :  { %vm1630_vm2 = vmmov %vm1624_vm0 }
 0x152   :  { %vm1631_vm3 = vmmov %vm1624_vm0 }
 0x153   :  { %vm1632_vm11 = vmmov %vm1624_vm0 }
 0x154   :  { %vm1633_vm13 = vmmov %vm1624_vm0 }
 0x155   :  { %vm1634_vm6 = vmmov %vm1624_vm0 }
 0x156   :  { %vm1635_vm9 = vmmov %vm1624_vm0 }
 0x16e   :  { %v655_v26 = vpop.f32.mrb[0].mxu0 }
 0x16f   :  { %v656_v58 = vadd.f32 %v1497_v61, %v655_v26  ;;  %v657_v1 = vpop.f32.mrb[1].mxu0 }
 0x171   :  { %v734_v0 = vmax.f32 %v656_v58, 0.0 }
 0x173   :  { %750 = vst.msk [vmem:[%s1582_s3] sm:$0xff] %vm1620_vm4, %v734_v0 }
 0x184   :  { %v695_v5 = vpop.f32.mrb[0].mxu1 }
 0x185   :  { %v696_v19 = vadd.f32 %v1497_v61, %v695_v5  ;;  %v697_v27 = vpop.f32.mrb[1].mxu1 }
 0x187   :  { %v742_v7 = vmax.f32 %v696_v19, 0.0 }
 0x188   :  { %v700_v28 = vpop.f32.mrb[2].mxu1 }
 0x189   :  { %758 = vst.msk [vmem:[%s1582_s3 + $0x40] sm:$0xff] %vm1621_vm10, %v742_v7  ;;  %v701_v29 = vadd.f32 %v1497_v61, %v700_v28  ;;  %v702_v30 = vpop.f32.mrb[3].mxu1 }
 0x18b   :  { %v743_v31 = vmax.f32 %v701_v29, 0.0 }
 0x18d   :  { %759 = vst.msk [vmem:[%s1582_s3 + $0x48] sm:$0xff] %vm1622_vm7, %v743_v31 }
 0x1a0   :  { %v660_v32 = vpop.f32.mrb[2].mxu0 }
 0x1a1   :  { %v661_v33 = vadd.f32 %v1497_v61, %v660_v32  ;;  %v662_v34 = vpop.f32.mrb[3].mxu0 }
 0x1a3   :  { %v735_v36 = vmax.f32 %v661_v33, 0.0 }
 0x1a4   :  { %v705_v35 = vpop.f32.mrb[4].mxu1 }
 0x1a5   :  { %v706_v37 = vadd.f32 %v1497_v61, %v705_v35  ;;  %v707_v38 = vpop.f32.mrb[5].mxu1  ;;  %v665_v39 = vpop.f32.mrb[4].mxu0  ;;  %751 = vst.msk [vmem:[%s1582_s3 + $0x8] sm:$0xff] %vm1623_vm12, %v735_v36 }
 0x1a6   :  { %v666_v40 = vadd.f32 %v1497_v61, %v665_v39  ;;  %v667_v42 = vpop.f32.mrb[5].mxu0 }
 0x1a7   :  { %v744_v41 = vmax.f32 %v706_v37, 0.0 }
 0x1a8   :  { %v736_v43 = vmax.f32 %v666_v40, 0.0 }
 0x1a9   :  { %760 = vst.msk [vmem:[%s1582_s3 + $0x50] sm:$0xff] %vm1624_vm0, %v744_v41 }
 0x1aa   :  { %752 = vst.msk [vmem:[%s1582_s3 + $0x10] sm:$0xff] %vm1625_vm14, %v736_v43 }
 0x1b0   :  { %v710_v44 = vpop.f32.mrb[6].mxu1 }
 0x1b1   :  { %v711_v45 = vadd.f32 %v1497_v61, %v710_v44  ;;  %v712_v46 = vpop.f32.mrb[7].mxu1 }
 0x1b3   :  { %v745_v47 = vmax.f32 %v711_v45, 0.0  ;;  %v670_v48 = vpop.f32.mrb[6].mxu0 }
 0x1b4   :  { %v671_v49 = vadd.f32 %v1497_v61, %v670_v48  ;;  %v672_v50 = vpop.f32.mrb[7].mxu0 }
 0x1b5   :  { %761 = vst.msk [vmem:[%s1582_s3 + $0x58] sm:$0xff] %vm1626_vm8, %v745_v47 }
 0x1b6   :  { %v737_v51 = vmax.f32 %v671_v49, 0.0 }
 0x1b8   :  { %753 = vst.msk [vmem:[%s1582_s3 + $0x18] sm:$0xff] %vm1627_vm15, %v737_v51 }
 0x1cb   :  { %v675_v52 = vpop.f32.mrb[8].mxu0 }
 0x1cc   :  { %v676_v53 = vadd.f32 %v1497_v61, %v675_v52  ;;  %v677_v54 = vpop.f32.mrb[9].mxu0 }
 0x1ce   :  { %v738_v55 = vmax.f32 %v676_v53, 0.0 }
 0x1cf   :  { %v715_v56 = vpop.f32.mrb[8].mxu1 }
 0x1d0   :  { %754 = vst.msk [vmem:[%s1582_s3 + $0x20] sm:$0xff] %vm1628_vm5, %v738_v55  ;;  %v716_v57 = vadd.f32 %v1497_v61, %v715_v56  ;;  %v717_v59 = vpop.f32.mrb[9].mxu1 }
 0x1d2   :  { %v746_v60 = vmax.f32 %v716_v57, 0.0 }
 0x1d4   :  { %762 = vst.msk [vmem:[%s1582_s3 + $0x60] sm:$0xff] %vm1629_vm1, %v746_v60 }
 0x1e0   :  { %v680_v62 = vpop.f32.mrb[10].mxu0 }
 0x1e1   :  { %v681_v63 = vadd.f32 %v1497_v61, %v680_v62  ;;  %v682_v2 = vpop.f32.mrb[11].mxu0 }
 0x1e3   :  { %v739_v3 = vmax.f32 %v681_v63, 0.0 }
 0x1e5   :  { %755 = vst.msk [vmem:[%s1582_s3 + $0x28] sm:$0xff] %vm1630_vm2, %v739_v3 }
 0x1e7   :  { %v720_v4 = vpop.f32.mrb[10].mxu1 }
 0x1e8   :  { %v721_v6 = vadd.f32 %v1497_v61, %v720_v4  ;;  %v722_v8 = vpop.f32.mrb[11].mxu1 }
 0x1ea   :  { %v747_v9 = vmax.f32 %v721_v6, 0.0 }
 0x1ec   :  { %763 = vst.msk [vmem:[%s1582_s3 + $0x68] sm:$0xff] %vm1631_vm3, %v747_v9 }
 0x1fc   :  { %v725_v10 = vpop.f32.mrb[12].mxu1 }
 0x1fd   :  { %v726_v11 = vadd.f32 %v1497_v61, %v725_v10  ;;  %v727_v12 = vpop.f32.mrb[13].mxu1 }
 0x1ff   :  { %v748_v13 = vmax.f32 %v726_v11, 0.0 }
 0x201   :  { %v685_v14 = vpop.f32.mrb[12].mxu0  ;;  %764 = vst.msk [vmem:[%s1582_s3 + $0x70] sm:$0xff] %vm1632_vm11, %v748_v13 }
 0x202   :  { %v686_v15 = vadd.f32 %v1497_v61, %v685_v14  ;;  %v687_v16 = vpop.f32.mrb[13].mxu0 }
 0x204   :  { %v740_v17 = vmax.f32 %v686_v15, 0.0 }
 0x206   :  { %756 = vst.msk [vmem:[%s1582_s3 + $0x30] sm:$0xff] %vm1633_vm13, %v740_v17 }
 0x217   :  { %v690_v18 = vpop.f32.mrb[14].mxu0 }
 0x218   :  { %v691_v20 = vadd.f32 %v1497_v61, %v690_v18  ;;  %v692_v21 = vpop.f32.mrb[15].mxu0 }
 0x21a   :  { %v741_v22 = vmax.f32 %v691_v20, 0.0 }
 0x21b   :  { %v730_v23 = vpop.f32.mrb[14].mxu1 }
 0x21c   :  { %757 = vst.msk [vmem:[%s1582_s3 + $0x38] sm:$0xff] %vm1634_vm6, %v741_v22  ;;  %v731_v24 = vadd.f32 %v1497_v61, %v730_v23  ;;  %v732_v25 = vpop.f32.mrb[15].mxu1 }
 0x21e   :  { %v749_v26 = vmax.f32 %v731_v24, 0.0 }
 0x220   :  { %765 = vst.msk [vmem:[%s1582_s3 + $0x78] sm:$0xff] %vm1635_vm9, %v749_v26 }

</bundles_post_ra>
